<compile_context>
chip_gen: v5e
topology: v5e:2x2
jax: 0.10.0
libtpu: 0.0.40
codegen_flags: <defaults>
</compile_context>

<pallas_src>
import jax
import jax.numpy as jnp
from jax import lax
from jax.experimental import pallas as pl
from jax.experimental.pallas import tpu as pltpu


def critic_kernel(x_ref, w1_ref, b1_ref, w2_ref, b2_ref, w3_ref, out_ref):
    """One batch tile: writes the critic value for TB rows as a (1, TB) lane-dense row."""
    cdtype = w1_ref.dtype                 # MXU input dtype (bf16 by default, f32 optional)
    x = x_ref[...].astype(cdtype)         # per-tile cast; no wrapper-side pass over the input

    # Layer 1: Linear(state_dim -> Hp) + Tanh.  f32 accumulate, f32 bias, f32 tanh (EUP).
    h1 = jnp.tanh(
        jnp.dot(x, w1_ref[...], preferred_element_type=jnp.float32) + b1_ref[...]
    )
    # Layer 2: Linear(Hp -> Hp) + Tanh.
    h2 = jnp.tanh(
        jnp.dot(h1.astype(cdtype), w2_ref[...], preferred_element_type=jnp.float32)
        + b2_ref[...]
    )
    # Layer 3: Linear(Hp -> 1) as (1, Hp) x (TB, Hp)^T -> (1, TB): batch lands on the LANE
    # axis, so the output tile is lane-dense and stored unmasked — no 128x broadcast write
    # amplification and no (TB,1)->(1,TB) relayout.  Padded Hp lanes are exact zeros.
    v = lax.dot_general(
        w3_ref[...], h2.astype(cdtype),
        dimension_numbers=(((1,), (1,)), ((), ())),
        preferred_element_type=jnp.float32,
    )
    out_ref[...] = v.astype(out_ref.dtype)


def prepare_params(params, compute_dtype=jnp.bfloat16):
    """Pad hidden dim to a multiple of 128 and cast MXU inputs ONCE (not per forward call).

    tanh(0)=0 and zero weight rows/cols contribute nothing, so padding is exact.  Biases
    stay f32 (added after the f32-accumulated matmul).  b3 is returned untouched and is
    folded in by the wrapper (no (1,1) VMEM tile / DMA for a single scalar).
    """
    w1, b1, w2, b2, w3, b3 = params
    S, H = w1.shape
    Hp = max(128, pl.cdiv(H, 128) * 128)
    ph = Hp - H
    w1p = jnp.pad(w1, ((0, 0), (0, ph))).astype(compute_dtype)
    b1p = jnp.pad(b1, ((0, 0), (0, ph))).astype(jnp.float32)
    w2p = jnp.pad(w2, ((0, ph), (0, ph))).astype(compute_dtype)
    b2p = jnp.pad(b2, ((0, 0), (0, ph))).astype(jnp.float32)
    w3p = jnp.pad(w3.reshape(1, H), ((0, 0), (0, ph))).astype(compute_dtype)
    return (w1p, b1p, w2p, b2p, w3p, b3.astype(jnp.float32))


def critic_forward(state, prepared, *, block_batch=512, min_tiles=1):
    """state: (B, state_dim) f32 -> value: (B, 1) f32.

    block_batch : target rows per grid step (amortizes the ~0.35 us per-step overhead and
                  feeds full 256-row LHS pushes to the MXU on v6e/v7x).
    min_tiles   : set to 2 on v7x so dimension_semantics=("parallel",) can shard the batch
                  tiles across both TensorCores even when B <= block_batch.
    """
    w1p, b1p, w2p, b2p, w3p, b3 = prepared
    B, S = state.shape
    Hp = w1p.shape[1]

    # ---- Batch tiling (batch ends up on the output LANE axis) -------------------------
    # Single tile: TB equals the full padded output width, so any multiple of 8 is legal
    # (<= 7 padded rows, e.g. B=300 -> one 304-row tile).  Multiple tiles: TB must be a
    # multiple of 128 so every output block is lane-aligned and stored unmasked; tiles are
    # balanced so there is no near-empty tail tile wasting MXU/EUP/DMA on single-TC chips.
    n_tiles = max(min_tiles, pl.cdiv(B, block_batch))
    if n_tiles == 1:
        TB = max(8, pl.cdiv(B, 8) * 8)
    else:
        TB = max(128, pl.cdiv(pl.cdiv(B, n_tiles), 128) * 128)
        n_tiles = max(min_tiles, pl.cdiv(B, TB))
    Bp = n_tiles * TB

    const = lambda i: (0, 0)  # weights/biases: same block every step -> resident in VMEM

    out_row = pl.pallas_call(
        critic_kernel,
        out_shape=jax.ShapeDtypeStruct((1, Bp), jnp.float32),
        grid=(n_tiles,),
        in_specs=[
            # Activations pipelined over the batch.  The input is NOT pre-padded in the
            # wrapper (that would be an extra full read+write of the batch): the last block
            # may read past row B; those rows hold unspecified data, flow only through
            # row-independent math (no batch-axis reductions) and are sliced off below.
            pl.BlockSpec((TB, S), lambda i: (i, 0)),
            pl.BlockSpec((S, Hp), const),
            pl.BlockSpec((1, Hp), const),
            pl.BlockSpec((Hp, Hp), const),
            pl.BlockSpec((1, Hp), const),
            pl.BlockSpec((1, Hp), const),
        ],
        out_specs=pl.BlockSpec((1, TB), lambda i: (0, i)),
        compiler_params=pltpu.CompilerParams(
            dimension_semantics=("parallel",),  # independent batch tiles (v7x: 2 TCs)
        ),
    )(state, w1p, b1p, w2p, b2p, w3p)

    # (1, Bp) -> (B, 1); fold in the scalar output bias here.
    return out_row[0, :B].reshape(B, 1) + b3


def init_params(key, state_dim, hidden_size=64):
    """Deterministic init mimicking nn.Linear's uniform(-1/sqrt(fan_in), 1/sqrt(fan_in))."""
    ks = jax.random.split(key, 6)

    def linear(kw, kb, fan_in, fan_out):
        bound = 1.0 / jnp.sqrt(jnp.float32(fan_in))
        w = jax.random.uniform(kw, (fan_in, fan_out), jnp.float32, -bound, bound)
        b = jax.random.uniform(kb, (1, fan_out), jnp.float32, -bound, bound)
        return w, b

    w1, b1 = linear(ks[0], ks[1], state_dim, hidden_size)
    w2, b2 = linear(ks[2], ks[3], hidden_size, hidden_size)
    w3, b3 = linear(ks[4], ks[5], hidden_size, 1)
    return (w1, b1, w2, b2, w3, b3)


def reference_forward(state, params):
    w1, b1, w2, b2, w3, b3 = params
    h1 = jnp.tanh(state @ w1 + b1)
    h2 = jnp.tanh(h1 @ w2 + b2)
    return h2 @ w3 + b3


if __name__ == "__main__":
    key = jax.random.PRNGKey(0)
    k_params, k_state = jax.random.split(key)

    batch = 300      # not a multiple of 8/128 -> exercises tail handling and output slicing
    state_dim = 8
    hidden = 64

    params = init_params(k_params, state_dim, hidden)
    state = jax.random.normal(k_state, (batch, state_dim), jnp.float32)
    ref = reference_forward(state, params)

    # f32 path: bit-faithful to the f32 reference (single balanced 304-row tile).
    prepared_f32 = prepare_params(params, jnp.float32)
    out_f32 = jax.block_until_ready(critic_forward(state, prepared_f32))
    assert out_f32.shape == (batch, 1), out_f32.shape
    assert jnp.allclose(out_f32, ref, atol=1e-5, rtol=1e-5), "f32 path mismatch vs reference"

    # f32 path, multi-tile: exercises balanced 128-row tiles + partial last input block.
    out_mt = jax.block_until_ready(critic_forward(state, prepared_f32, block_batch=128))
    assert jnp.allclose(out_mt, ref, atol=1e-5, rtol=1e-5), "multi-tile path mismatch"

    # Default bf16 MXU-input path (f32 accumulation / bias / tanh): loose tolerance.
    prepared_bf16 = prepare_params(params)  # compute_dtype=jnp.bfloat16
    out_bf16 = jax.block_until_ready(critic_forward(state, prepared_bf16))
    assert out_bf16.shape == (batch, 1), out_bf16.shape
    assert jnp.allclose(out_bf16, ref, atol=5e-2, rtol=5e-2), "bf16 path mismatch vs reference"

    print("KERNEL_OK")
</pallas_src>

<mosaic_0001>
module attributes {stable_mosaic.version = 11 : i64} {
  func.func @critic_kernel(%arg0: i32, %arg1: memref<304x8xf32, #tpu.memory_space<vmem>>, %arg2: memref<8x128xf32, #tpu.memory_space<vmem>>, %arg3: memref<1x128xf32, #tpu.memory_space<vmem>>, %arg4: memref<128x128xf32, #tpu.memory_space<vmem>>, %arg5: memref<1x128xf32, #tpu.memory_space<vmem>>, %arg6: memref<1x128xf32, #tpu.memory_space<vmem>>, %arg7: memref<1x304xf32, #tpu.memory_space<vmem>>) attributes {dimension_semantics = [#tpu.dimension_semantics<parallel>], iteration_bounds = array<i64: 1>, scalar_prefetch = 0 : i64, scratch_operands = 0 : i64, tpu.core_type = #tpu.core_type<tc>, window_params = [{transform_indices = @transform_0, window_bounds = array<i64: 304, 8>}, {pipeline_mode = #tpu.pipeline_mode<synchronous>, transform_indices = @transform_1, window_bounds = array<i64: 8, 128>}, {pipeline_mode = #tpu.pipeline_mode<synchronous>, transform_indices = @transform_2, window_bounds = array<i64: 1, 128>}, {pipeline_mode = #tpu.pipeline_mode<synchronous>, transform_indices = @transform_3, window_bounds = array<i64: 128, 128>}, {pipeline_mode = #tpu.pipeline_mode<synchronous>, transform_indices = @transform_4, window_bounds = array<i64: 1, 128>}, {pipeline_mode = #tpu.pipeline_mode<synchronous>, transform_indices = @transform_5, window_bounds = array<i64: 1, 128>}, {transform_indices = @transform_6, window_bounds = array<i64: 1, 304>}]} {
    %c0 = arith.constant 0 : index
    %c0_0 = arith.constant 0 : index
    %0 = vector.load %arg1[%c0, %c0_0] : memref<304x8xf32, #tpu.memory_space<vmem>>, vector<304x8xf32>
    %c0_1 = arith.constant 0 : index
    %c0_2 = arith.constant 0 : index
    %1 = vector.load %arg2[%c0_1, %c0_2] : memref<8x128xf32, #tpu.memory_space<vmem>>, vector<8x128xf32>
    %cst = arith.constant dense<0.000000e+00> : vector<304x128xf32>
    %2 = tpu.matmul %0, %1, %cst {dimension_numbers = #tpu.dot_dimension_numbers<[1], [0], [0], [1], [0, 0, 1, 1], [], []>} : vector<304x8xf32>, vector<8x128xf32>, vector<304x128xf32> -> vector<304x128xf32>
    %c0_3 = arith.constant 0 : index
    %c0_4 = arith.constant 0 : index
    %3 = vector.load %arg3[%c0_3, %c0_4] : memref<1x128xf32, #tpu.memory_space<vmem>>, vector<1x128xf32>
    %4 = vector.broadcast %3 : vector<1x128xf32> to vector<304x128xf32>
    %5 = arith.addf %2, %4 : vector<304x128xf32>
    %6 = math.tanh %5 : vector<304x128xf32>
    %c0_5 = arith.constant 0 : index
    %c0_6 = arith.constant 0 : index
    %7 = vector.load %arg4[%c0_5, %c0_6] : memref<128x128xf32, #tpu.memory_space<vmem>>, vector<128x128xf32>
    %cst_7 = arith.constant dense<0.000000e+00> : vector<304x128xf32>
    %8 = tpu.matmul %6, %7, %cst_7 {dimension_numbers = #tpu.dot_dimension_numbers<[1], [0], [0], [1], [0, 0, 1, 1], [], []>} : vector<304x128xf32>, vector<128x128xf32>, vector<304x128xf32> -> vector<304x128xf32>
    %c0_8 = arith.constant 0 : index
    %c0_9 = arith.constant 0 : index
    %9 = vector.load %arg5[%c0_8, %c0_9] : memref<1x128xf32, #tpu.memory_space<vmem>>, vector<1x128xf32>
    %10 = vector.broadcast %9 : vector<1x128xf32> to vector<304x128xf32>
    %11 = arith.addf %8, %10 : vector<304x128xf32>
    %12 = math.tanh %11 : vector<304x128xf32>
    %c0_10 = arith.constant 0 : index
    %c0_11 = arith.constant 0 : index
    %13 = vector.load %arg6[%c0_10, %c0_11] : memref<1x128xf32, #tpu.memory_space<vmem>>, vector<1x128xf32>
    %cst_12 = arith.constant dense<0.000000e+00> : vector<1x304xf32>
    %14 = tpu.matmul %13, %12, %cst_12 {dimension_numbers = #tpu.dot_dimension_numbers<[1], [1], [0], [0], [0, 0, 1, 0], [], []>} : vector<1x128xf32>, vector<304x128xf32>, vector<1x304xf32> -> vector<1x304xf32>
    %c0_13 = arith.constant 0 : index
    %c0_14 = arith.constant 0 : index
    %15 = vector.load %arg7[%c0_13, %c0_14] : memref<1x304xf32, #tpu.memory_space<vmem>>, vector<1x304xf32>
    tpu.vector_store %arg7[%c0_13, %c0_14], %14 {strides = array<i32>} : memref<1x304xf32, #tpu.memory_space<vmem>>, vector<1x304xf32>,
    return
  }
  func.func @transform_0(%arg0: i32) -> (i32, i32) {
    %c0_i32 = arith.constant 0 : i32
    %c0_i32_0 = arith.constant 0 : i32
    return %arg0, %c0_i32 : i32, i32
  }
  func.func @transform_1(%arg0: i32) -> (i32, i32) {
    %c0_i32 = arith.constant 0 : i32
    %c0_i32_0 = arith.constant 0 : i32
    %c0_i32_1 = arith.constant 0 : i32
    return %c0_i32, %c0_i32_0 : i32, i32
  }
  func.func @transform_2(%arg0: i32) -> (i32, i32) {
    %c0_i32 = arith.constant 0 : i32
    %c0_i32_0 = arith.constant 0 : i32
    %c0_i32_1 = arith.constant 0 : i32
    return %c0_i32, %c0_i32_0 : i32, i32
  }
  func.func @transform_3(%arg0: i32) -> (i32, i32) {
    %c0_i32 = arith.constant 0 : i32
    %c0_i32_0 = arith.constant 0 : i32
    %c0_i32_1 = arith.constant 0 : i32
    return %c0_i32, %c0_i32_0 : i32, i32
  }
  func.func @transform_4(%arg0: i32) -> (i32, i32) {
    %c0_i32 = arith.constant 0 : i32
    %c0_i32_0 = arith.constant 0 : i32
    %c0_i32_1 = arith.constant 0 : i32
    return %c0_i32, %c0_i32_0 : i32, i32
  }
  func.func @transform_5(%arg0: i32) -> (i32, i32) {
    %c0_i32 = arith.constant 0 : i32
    %c0_i32_0 = arith.constant 0 : i32
    %c0_i32_1 = arith.constant 0 : i32
    return %c0_i32, %c0_i32_0 : i32, i32
  }
  func.func @transform_6(%arg0: i32) -> (i32, i32) {
    %c0_i32 = arith.constant 0 : i32
    %c0_i32_0 = arith.constant 0 : i32
    return %c0_i32, %arg0 : i32, i32
  }
}

</mosaic_0001>

<bundles_post_ra>
// kernel: tpu_custom_call.1
= control target key start
LH: loop header
LB: loop body
LE: loop exit
PB: predicated region body
PF: predicated region fallthrough
CT: control target
= control target key end

     0   :  { %vm67_vm0 = vcmask 64512   ;;  %s1241_s0 = inlined_call_operand.vmem [shape: f32[300,8], index: 0, kind: input, shape index: {}]   ;;  %s1242_s1 = inlined_call_operand.vmem [shape: f32[8,128], index: 1, kind: input, shape index: {}]   ;;  %s1243_s2 = inlined_call_operand.vmem [shape: f32[1,128], index: 2, kind: input, shape index: {}]   ;;  %s1244_s3 = inlined_call_operand.vmem [shape: f32[128,128], index: 3, kind: input, shape index: {}]   ;;  %s1245_s4 = inlined_call_operand.vmem [shape: f32[1,128], index: 4, kind: input, shape index: {}]   ;;  %s1246_s5 = inlined_call_operand.vmem [shape: f32[1,128], index: 5, kind: input, shape index: {}]   ;;  %s1247_s6 = inlined_call_operand.hbm [shape: f32[1,304], index: 6, kind: output, shape index: {}]  }
   0x1   :  { %v62_v0 = vld [vmem:[%s1242_s1] sm:$0xff] }
   0x2   :  { %v24_v1 = vld [vmem:[%s1241_s0] sm:$0xff]  ;;  %197 = vmatpush.msra.mxu0 %v62_v0  ;;  %670 = vmatpush.msra.mxu2 %v62_v0 }
   0x3   :  { %632 = vmatmul.msk.f32.vlgmr.msra.gmra.mxu0 %vm67_vm0, %v24_v1 }
   0x4   :  { %11 = vsyncpa [#allocation3], 0  ;;  %v25_v2 = vld [vmem:[%s1241_s0 + $0x8] sm:$0xff]  ;;  %v26_v3 = vld [vmem:[%s1241_s0 + $0x10] sm:$0xff]  ;;  %vm606_vm1 = vcmask 1040384   ;;  %s623_s9 = sshll.u32 %s1247_s6, 4  ;;  %s624_s9 = int_to_ptr.hbm [resolvable:$true] %s623_s9 }
   0x5   :  { %v27_v4 = vld [vmem:[%s1241_s0 + $0x18] sm:$0xff]  ;;  %v28_v5 = vld [vmem:[%s1241_s0 + $0x20] sm:$0xff]  ;;  %v29_v6 = vld [vmem:[%s1241_s0 + $0x28] sm:$0xff]  ;;  %vm608_vm2 = vcmask 1041408  }
   0x6   :  { %v30_v7 = vld [vmem:[%s1241_s0 + $0x30] sm:$0xff]  ;;  %v31_v8 = vld [vmem:[%s1241_s0 + $0x38] sm:$0xff]  ;;  %v32_v9 = vld [vmem:[%s1241_s0 + $0x40] sm:$0xff] }
   0x7   :  { %v33_v10 = vld [vmem:[%s1241_s0 + $0x48] sm:$0xff]  ;;  %v366_v11 = vld [vmem:[%s1244_s3 + $0x78] sm:$0xff]  ;;  %v365_v12 = vld [vmem:[%s1244_s3 + $0x70] sm:$0xff] }
   0x8   :  { %371 = vmatpush.msra.mxu1 %v366_v11  ;;  %v364_v13 = vld [vmem:[%s1244_s3 + $0x68] sm:$0xff]  ;;  %671 = vmatpush.msra.mxu3 %v366_v11  ;;  %v363_v14 = vld [vmem:[%s1244_s3 + $0x60] sm:$0xff]  ;;  %v34_v15 = vld [vmem:[%s1241_s0 + $0x50] sm:$0xff] }
   0x9   :  { %v362_v16 = vld [vmem:[%s1244_s3 + $0x58] sm:$0xff]  ;;  %v361_v17 = vld [vmem:[%s1244_s3 + $0x50] sm:$0xff]  ;;  %v360_v18 = vld [vmem:[%s1244_s3 + $0x48] sm:$0xff] }
   0xa   :  { %372 = vmatpush.msra.mxu1 %v365_v12  ;;  %672 = vmatpush.msra.mxu3 %v365_v12  ;;  %v359_v19 = vld [vmem:[%s1244_s3 + $0x40] sm:$0xff]  ;;  %v35_v20 = vld [vmem:[%s1241_s0 + $0x58] sm:$0xff]  ;;  %v357_v22 = vld [vmem:[%s1244_s3 + $0x30] sm:$0xff] }
   0xb   :  { %633 = vmatmul.msk.f32.gmra.mxu0 %vm67_vm0, %v25_v2  ;;  %v358_v21 = vld [vmem:[%s1244_s3 + $0x38] sm:$0xff]  ;;  %v356_v23 = vld [vmem:[%s1244_s3 + $0x28] sm:$0xff]  ;;  %v36_v24 = vld [vmem:[%s1241_s0 + $0x60] sm:$0xff] }
   0xc   :  { %373 = vmatpush.msra.mxu1 %v364_v13  ;;  %673 = vmatpush.msra.mxu3 %v364_v13  ;;  %v355_v25 = vld [vmem:[%s1244_s3 + $0x20] sm:$0xff]  ;;  %v354_v26 = vld [vmem:[%s1244_s3 + $0x18] sm:$0xff]  ;;  %v353_v27 = vld [vmem:[%s1244_s3 + $0x10] sm:$0xff] }
   0xd   :  { %v352_v28 = vld [vmem:[%s1244_s3 + $0x8] sm:$0xff]  ;;  %v351_v30 = vld [vmem:[%s1244_s3] sm:$0xff]  ;;  %v38_v31 = vld [vmem:[%s1241_s0 + $0x70] sm:$0xff] }
   0xe   :  { %374 = vmatpush.msra.mxu1 %v363_v14  ;;  %674 = vmatpush.msra.mxu3 %v363_v14  ;;  %v37_v29 = vld [vmem:[%s1241_s0 + $0x68] sm:$0xff]  ;;  %v39_v32 = vld [vmem:[%s1241_s0 + $0x78] sm:$0xff]  ;;  %v1022_v33 = vld [vmem:[%s1243_s2] ss:$0 sm:$0xff] }
   0xf   :  { %v40_v35 = vld [vmem:[%s1241_s0 + $0x80] sm:$0xff]  ;;  %v41_v38 = vld [vmem:[%s1241_s0 + $0x88] sm:$0xff]  ;;  %v42_v42 = vld [vmem:[%s1241_s0 + $0x90] sm:$0xff] }
  0x10   :  { %375 = vmatpush.msra.mxu1 %v362_v16  ;;  %675 = vmatpush.msra.mxu3 %v362_v16  ;;  %v47_v45 = vld [vmem:[%s1241_s0 + $0xb8] sm:$0xff]  ;;  %v48_v50 = vld [vmem:[%s1241_s0 + $0xc0] sm:$0xff]  ;;  %v49_v55 = vld [vmem:[%s1241_s0 + $0xc8] sm:$0xff] }
  0x11   :  { %655 = vmatmul.msk.f32.vlgmr.msra.gmra.mxu2 %vm67_vm0, %v47_v45  ;;  %v43_v47 = vld [vmem:[%s1241_s0 + $0x98] sm:$0xff]  ;;  %v44_v52 = vld [vmem:[%s1241_s0 + $0xa0] sm:$0xff]  ;;  %v45_v57 = vld [vmem:[%s1241_s0 + $0xa8] sm:$0xff] }
  0x12   :  { %376 = vmatpush.msra.mxu1 %v361_v17  ;;  %676 = vmatpush.msra.mxu3 %v361_v17  ;;  %v50_v60 = vld [vmem:[%s1241_s0 + $0xd0] sm:$0xff]  ;;  %v51_v1 = vld [vmem:[%s1241_s0 + $0xd8] sm:$0xff] }
  0x13   :  { %634 = vmatmul.msk.f32.gmra.mxu0 %vm67_vm0, %v26_v3  ;;  %v46_v62 = vld [vmem:[%s1241_s0 + $0xb0] sm:$0xff]  ;;  %v55_v17 = vld [vmem:[%s1241_s0 + $0xf8] sm:$0xff] }
  0x14   :  { %377 = vmatpush.msra.mxu1 %v360_v18  ;;  %677 = vmatpush.msra.mxu3 %v360_v18  ;;  %v54_v13 = vld [vmem:[%s1241_s0 + $0xf0] sm:$0xff] }
  0x16   :  { %378 = vmatpush.msra.mxu1 %v359_v19  ;;  %678 = vmatpush.msra.mxu3 %v359_v19 }
  0x18   :  { %379 = vmatpush.msra.mxu1 %v358_v21  ;;  %679 = vmatpush.msra.mxu3 %v358_v21  ;;  %v56_v21 = vld [vmem:[%s1241_s0 + $0x100] sm:$0xff] }
  0x19   :  { %656 = vmatmul.msk.f32.gmra.mxu2 %vm67_vm0, %v48_v50 }
  0x1a   :  { %380 = vmatpush.msra.mxu1 %v357_v22  ;;  %680 = vmatpush.msra.mxu3 %v357_v22 }
  0x1b   :  { %635 = vmatmul.msk.f32.gmra.mxu0 %vm67_vm0, %v27_v4 }
  0x1c   :  { %381 = vmatpush.msra.mxu1 %v356_v23  ;;  %681 = vmatpush.msra.mxu3 %v356_v23 }
  0x1e   :  { %382 = vmatpush.msra.mxu1 %v355_v25  ;;  %682 = vmatpush.msra.mxu3 %v355_v25  ;;  %v57_v25 = vld [vmem:[%s1241_s0 + $0x108] sm:$0xff] }
  0x20   :  { %383 = vmatpush.msra.mxu1 %v354_v26  ;;  %683 = vmatpush.msra.mxu3 %v354_v26 }
  0x21   :  { %657 = vmatmul.msk.f32.gmra.mxu2 %vm67_vm0, %v49_v55 }
  0x22   :  { %384 = vmatpush.msra.mxu1 %v353_v27  ;;  %684 = vmatpush.msra.mxu3 %v353_v27 }
  0x23   :  { %636 = vmatmul.msk.f32.gmra.mxu0 %vm67_vm0, %v28_v5  ;;  %v52_v5 = vld [vmem:[%s1241_s0 + $0xe0] sm:$0xff] }
  0x24   :  { %385 = vmatpush.msra.mxu1 %v352_v28  ;;  %685 = vmatpush.msra.mxu3 %v352_v28 }
  0x26   :  { %386 = vmatpush.msra.mxu1 %v351_v30  ;;  %686 = vmatpush.msra.mxu3 %v351_v30 }
  0x29   :  { %658 = vmatmul.msk.f32.gmra.mxu2 %vm67_vm0, %v50_v60 }
  0x2b   :  { %637 = vmatmul.msk.f32.gmra.mxu0 %vm67_vm0, %v29_v6 }
  0x31   :  { %659 = vmatmul.msk.f32.gmra.mxu2 %vm67_vm0, %v51_v1 }
  0x33   :  { %638 = vmatmul.msk.f32.gmra.mxu0 %vm67_vm0, %v30_v7 }
  0x39   :  { %660 = vmatmul.msk.f32.gmra.mxu2 %vm67_vm0, %v52_v5 }
  0x3b   :  { %639 = vmatmul.msk.f32.gmra.mxu0 %vm67_vm0, %v31_v8 }
  0x43   :  { %640 = vmatmul.msk.f32.gmra.mxu0 %vm67_vm0, %v32_v9  ;;  %v53_v9 = vld [vmem:[%s1241_s0 + $0xe8] sm:$0xff] }
  0x44   :  { %661 = vmatmul.msk.f32.gmra.mxu2 %vm67_vm0, %v53_v9 }
  0x4b   :  { %641 = vmatmul.msk.f32.gmra.mxu0 %vm67_vm0, %v33_v10 }
  0x4c   :  { %662 = vmatmul.msk.f32.gmra.mxu2 %vm67_vm0, %v54_v13 }
  0x53   :  { %642 = vmatmul.msk.f32.gmra.mxu0 %vm67_vm0, %v34_v15 }
  0x54   :  { %663 = vmatmul.msk.f32.gmra.mxu2 %vm67_vm0, %v55_v17 }
  0x5b   :  { %643 = vmatmul.msk.f32.gmra.mxu0 %vm67_vm0, %v35_v20 }
  0x5c   :  { %664 = vmatmul.msk.f32.gmra.mxu2 %vm67_vm0, %v56_v21 }
  0x63   :  { %644 = vmatmul.msk.f32.gmra.mxu0 %vm67_vm0, %v36_v24 }
  0x64   :  { %665 = vmatmul.msk.f32.gmra.mxu2 %vm67_vm0, %v57_v25 }
  0x6b   :  { %645 = vmatmul.msk.f32.gmra.mxu0 %vm67_vm0, %v37_v29  ;;  %v58_v29 = vld [vmem:[%s1241_s0 + $0x110] sm:$0xff] }
  0x6c   :  { %666 = vmatmul.msk.f32.gmra.mxu2 %vm67_vm0, %v58_v29 }
  0x73   :  { %646 = vmatmul.msk.f32.gmra.mxu0 %vm67_vm0, %v38_v31 }
  0x7b   :  { %647 = vmatmul.msk.f32.gmra.mxu0 %vm67_vm0, %v39_v32 }
  0x80   :  { %v199_v34 = vpop.f32.mrf.mxu0 }
  0x81   :  { %v200_v36 = vadd.f32 %v1022_v33, %v199_v34  ;;  %v59_v34 = vld [vmem:[%s1241_s0 + $0x118] sm:$0xff] }
  0x82   :  { %667 = vmatmul.msk.f32.gmra.mxu2 %vm67_vm0, %v59_v34 }
  0x83   :  { %690 = vtanh.f32 %v200_v36  ;;  %648 = vmatmul.msk.f32.gmra.mxu0 %vm67_vm0, %v40_v35 }
  0x88   :  { %v202_v37 = vpop.f32.mrf.mxu0 }
  0x89   :  { %v691_v39 = vpop.eup %690  ;;  %v203_v40 = vadd.f32 %v1022_v33, %v202_v37 }
  0x8a   :  { %387 = vmatmul.f32.vlgmr.msra.gmra.mxu1 %v691_v39 }
  0x8b   :  { %692 = vtanh.f32 %v203_v40  ;;  %649 = vmatmul.msk.f32.gmra.mxu0 %vm67_vm0, %v41_v38  ;;  %v60_v38 = vld [vmem:[%s1241_s0 + $0x120] sm:$0xff] }
  0x8c   :  { %668 = vmatmul.msk.f32.gmra.mxu2 %vm67_vm0, %v60_v38 }
  0x90   :  { %v205_v41 = vpop.f32.mrf.mxu0 }
  0x91   :  { %v693_v43 = vpop.eup %692  ;;  %v206_v44 = vadd.f32 %v1022_v33, %v205_v41 }
  0x92   :  { %390 = vmatmul.f32.gmra.mxu1 %v693_v43 }
  0x93   :  { %694 = vtanh.f32 %v206_v44  ;;  %650 = vmatmul.msk.f32.gmra.mxu0 %vm67_vm0, %v42_v42  ;;  %v61_v42 = vld [vmem:[%s1241_s0 + $0x128] sm:$0xff] }
  0x94   :  { %669 = vmatmul.msk.f32.gmra.mxu2 %vm67_vm0, %v61_v42 }
  0x98   :  { %v208_v46 = vpop.f32.mrf.mxu0 }
  0x99   :  { %v695_v48 = vpop.eup %694  ;;  %v209_v49 = vadd.f32 %v1022_v33, %v208_v46 }
  0x9a   :  { %393 = vmatmul.f32.gmra.mxu1 %v695_v48 }
  0x9b   :  { %696 = vtanh.f32 %v209_v49  ;;  %651 = vmatmul.msk.f32.gmra.mxu0 %vm67_vm0, %v43_v47 }
  0xa0   :  { %v211_v51 = vpop.f32.mrf.mxu0 }
  0xa1   :  { %v697_v53 = vpop.eup %696  ;;  %v212_v54 = vadd.f32 %v1022_v33, %v211_v51 }
  0xa2   :  { %396 = vmatmul.f32.gmra.mxu1 %v697_v53  ;;  %v268_v53 = vpop.f32.mrf.mxu2 }
  0xa3   :  { %698 = vtanh.f32 %v212_v54  ;;  %652 = vmatmul.msk.f32.gmra.mxu0 %vm67_vm0, %v44_v52 }
  0xa8   :  { %v214_v56 = vpop.f32.mrf.mxu0 }
  0xa9   :  { %v699_v58 = vpop.eup %698  ;;  %v215_v59 = vadd.f32 %v1022_v33, %v214_v56 }
  0xaa   :  { %399 = vmatmul.f32.gmra.mxu1 %v699_v58  ;;  %v271_v58 = vpop.f32.mrf.mxu2 }
  0xab   :  { %700 = vtanh.f32 %v215_v59  ;;  %653 = vmatmul.msk.f32.gmra.mxu0 %vm67_vm0, %v45_v57 }
  0xb0   :  { %v217_v61 = vpop.f32.mrf.mxu0 }
  0xb1   :  { %v701_v63 = vpop.eup %700  ;;  %v218_v0 = vadd.f32 %v1022_v33, %v217_v61 }
  0xb2   :  { %402 = vmatmul.f32.gmra.mxu1 %v701_v63  ;;  %v274_v1 = vpop.f32.mrf.mxu2 }
  0xb3   :  { %702 = vtanh.f32 %v218_v0  ;;  %654 = vmatmul.msk.f32.gmra.mxu0 %vm67_vm0, %v46_v62 }
  0xb8   :  { %v220_v2 = vpop.f32.mrf.mxu0 }
  0xb9   :  { %v703_v3 = vpop.eup %702  ;;  %v221_v4 = vadd.f32 %v1022_v33, %v220_v2 }
  0xba   :  { %405 = vmatmul.f32.gmra.mxu1 %v703_v3 }
  0xbb   :  { %704 = vtanh.f32 %v221_v4 }
  0xc0   :  { %v223_v6 = vpop.f32.mrf.mxu0 }
  0xc1   :  { %v705_v7 = vpop.eup %704  ;;  %v224_v8 = vadd.f32 %v1022_v33, %v223_v6  ;;  %v277_v6 = vpop.f32.mrf.mxu2 }
  0xc2   :  { %408 = vmatmul.f32.gmra.mxu1 %v705_v7  ;;  %v269_v7 = vadd.f32 %v1022_v33, %v268_v53 }
  0xc3   :  { %706 = vtanh.f32 %v224_v8 }
  0xc8   :  { %v226_v10 = vpop.f32.mrf.mxu0 }
  0xc9   :  { %v707_v11 = vpop.eup %706  ;;  %v227_v12 = vadd.f32 %v1022_v33, %v226_v10  ;;  %v272_v10 = vadd.f32 %v1022_v33, %v271_v58 }
  0xca   :  { %411 = vmatmul.f32.gmra.mxu1 %v707_v11  ;;  %v280_v11 = vpop.f32.mrf.mxu2 }
  0xcb   :  { %708 = vtanh.f32 %v227_v12 }
  0xd0   :  { %v229_v14 = vpop.f32.mrf.mxu0 }
  0xd1   :  { %v709_v15 = vpop.eup %708  ;;  %v230_v16 = vadd.f32 %v1022_v33, %v229_v14  ;;  %v275_v14 = vadd.f32 %v1022_v33, %v274_v1 }
  0xd2   :  { %414 = vmatmul.f32.gmra.mxu1 %v709_v15  ;;  %v283_v17 = vpop.f32.mrf.mxu2 }
  0xd3   :  { %710 = vtanh.f32 %v230_v16 }
  0xd8   :  { %v232_v18 = vpop.f32.mrf.mxu0 }
  0xd9   :  { %v711_v19 = vpop.eup %710  ;;  %v233_v20 = vadd.f32 %v1022_v33, %v232_v18  ;;  %v278_v18 = vadd.f32 %v1022_v33, %v277_v6 }
  0xda   :  { %417 = vmatmul.f32.gmra.mxu1 %v711_v19  ;;  %v286_v21 = vpop.f32.mrf.mxu2 }
  0xdb   :  { %712 = vtanh.f32 %v233_v20  ;;  %v287_v29 = vadd.f32 %v1022_v33, %v286_v21 }
  0xe0   :  { %v235_v22 = vpop.f32.mrf.mxu0 }
  0xe1   :  { %v713_v23 = vpop.eup %712  ;;  %v236_v24 = vadd.f32 %v1022_v33, %v235_v22  ;;  %v281_v22 = vadd.f32 %v1022_v33, %v280_v11 }
  0xe2   :  { %420 = vmatmul.f32.gmra.mxu1 %v713_v23  ;;  %v289_v25 = vpop.f32.mrf.mxu2 }
  0xe3   :  { %714 = vtanh.f32 %v236_v24  ;;  %v290_v34 = vadd.f32 %v1022_v33, %v289_v25 }
  0xe8   :  { %v238_v26 = vpop.f32.mrf.mxu0 }
  0xe9   :  { %v715_v27 = vpop.eup %714  ;;  %v239_v28 = vadd.f32 %v1022_v33, %v238_v26  ;;  %v284_v26 = vadd.f32 %v1022_v33, %v283_v17 }
  0xea   :  { %423 = vmatmul.f32.gmra.mxu1 %v715_v27 }
  0xeb   :  { %716 = vtanh.f32 %v239_v28 }
  0xf0   :  { %v241_v30 = vpop.f32.mrf.mxu0 }
  0xf1   :  { %v717_v31 = vpop.eup %716  ;;  %v242_v32 = vadd.f32 %v1022_v33, %v241_v30  ;;  %v292_v30 = vpop.f32.mrf.mxu2 }
  0xf2   :  { %426 = vmatmul.f32.gmra.mxu1 %v717_v31  ;;  %v293_v38 = vadd.f32 %v1022_v33, %v292_v30 }
  0xf3   :  { %718 = vtanh.f32 %v242_v32 }
  0xf8   :  { %v244_v35 = vpop.f32.mrf.mxu0 }
  0xf9   :  { %v719_v36 = vpop.eup %718  ;;  %v245_v37 = vadd.f32 %v1022_v33, %v244_v35 }
  0xfa   :  { %429 = vmatmul.f32.gmra.mxu1 %v719_v36 }
  0xfb   :  { %720 = vtanh.f32 %v245_v37  ;;  %v295_v37 = vpop.f32.mrf.mxu2 }
  0xfc   :  { %v296_v42 = vadd.f32 %v1022_v33, %v295_v37 }
 0x100   :  { %v247_v39 = vpop.f32.mrf.mxu0 }
 0x101   :  { %v721_v40 = vpop.eup %720  ;;  %v248_v41 = vadd.f32 %v1022_v33, %v247_v39 }
 0x102   :  { %432 = vmatmul.f32.gmra.mxu1 %v721_v40 }
 0x103   :  { %722 = vtanh.f32 %v248_v41  ;;  %v298_v41 = vpop.f32.mrf.mxu2 }
 0x107   :  { %v1129_v43 = vpop.f32.mrf.mxu1 }
 0x108   :  { %v250_v44 = vpop.f32.mrf.mxu0 }
 0x109   :  { %v723_v45 = vpop.eup %722  ;;  %v251_v46 = vadd.f32 %v1022_v33, %v250_v44  ;;  %v1168_v44 = vld [vmem:[%s1245_s4] ss:$0 sm:$0xff] }
 0x10a   :  { %435 = vmatmul.f32.gmra.mxu1 %v723_v45 }
 0x10b   :  { %724 = vtanh.f32 %v251_v46 }
 0x10f   :  { %v1132_v47 = vpop.f32.mrf.mxu1 }
 0x110   :  { %v253_v48 = vpop.f32.mrf.mxu0 }
 0x111   :  { %v725_v49 = vpop.eup %724  ;;  %v254_v50 = vadd.f32 %v1022_v33, %v253_v48 }
 0x112   :  { %438 = vmatmul.f32.gmra.mxu1 %v725_v49 }
 0x113   :  { %726 = vtanh.f32 %v254_v50  ;;  %v301_v50 = vpop.f32.mrf.mxu2 }
 0x117   :  { %v1135_v51 = vpop.f32.mrf.mxu1 }
 0x118   :  { %v256_v52 = vpop.f32.mrf.mxu0 }
 0x119   :  { %v727_v54 = vpop.eup %726  ;;  %v257_v55 = vadd.f32 %v1022_v33, %v256_v52  ;;  %v299_v52 = vadd.f32 %v1022_v33, %v298_v41 }
 0x11a   :  { %441 = vmatmul.f32.gmra.mxu1 %v727_v54 }
 0x11b   :  { %728 = vtanh.f32 %v257_v55 }
 0x11f   :  { %v1138_v56 = vpop.f32.mrf.mxu1 }
 0x120   :  { %v259_v57 = vpop.f32.mrf.mxu0 }
 0x121   :  { %v729_v59 = vpop.eup %728  ;;  %v260_v60 = vadd.f32 %v1022_v33, %v259_v57 }
 0x122   :  { %444 = vmatmul.f32.gmra.mxu1 %v729_v59  ;;  %v302_v59 = vadd.f32 %v1022_v33, %v301_v50 }
 0x123   :  { %730 = vtanh.f32 %v260_v60 }
 0x127   :  { %v1141_v61 = vpop.f32.mrf.mxu1 }
 0x128   :  { %v262_v62 = vpop.f32.mrf.mxu0 }
 0x129   :  { %v731_v63 = vpop.eup %730  ;;  %v263_v0 = vadd.f32 %v1022_v33, %v262_v62  ;;  %v304_v62 = vpop.f32.mrf.mxu2 }
 0x12a   :  { %447 = vmatmul.f32.gmra.mxu1 %v731_v63 }
 0x12b   :  { %732 = vtanh.f32 %v263_v0 }
 0x12f   :  { %v1144_v2 = vpop.f32.mrf.mxu1 }
 0x130   :  { %v265_v3 = vpop.f32.mrf.mxu0  ;;  %v404_v21 = vadd.f32 %v1168_v44, %v1144_v2  ;;  %v395_v2 = vadd.f32 %v1168_v44, %v1135_v51 }
 0x131   :  { %v733_v4 = vpop.eup %732  ;;  %v266_v5 = vadd.f32 %v1022_v33, %v265_v3 }
 0x132   :  { %450 = vmatmul.f32.vlgmr.msra.gmra.mxu3 %v733_v4  ;;  %v305_v4 = vadd.f32 %v1022_v33, %v304_v62 }
 0x133   :  { %734 = vtanh.f32 %v266_v5 }
 0x134   :  { %736 = vtanh.f32 %v269_v7 }
 0x135   :  { %738 = vtanh.f32 %v272_v10 }
 0x136   :  { %740 = vtanh.f32 %v275_v14 }
 0x137   :  { %v1148_v8 = vpop.f32.mrf.mxu1  ;;  %742 = vtanh.f32 %v278_v18 }
 0x138   :  { %744 = vtanh.f32 %v281_v22  ;;  %v407_v18 = vadd.f32 %v1168_v44, %v1148_v8 }
 0x139   :  { %v735_v9 = vpop.eup %734  ;;  %746 = vtanh.f32 %v284_v26 }
 0x13a   :  { %453 = vmatmul.f32.gmra.mxu3 %v735_v9  ;;  %v737_v12 = vpop.eup %736  ;;  %748 = vtanh.f32 %v287_v29  ;;  %v307_v9 = vpop.f32.mrf.mxu2 }
 0x13b   :  { %v739_v15 = vpop.eup %738  ;;  %750 = vtanh.f32 %v290_v34 }
 0x13c   :  { %v741_v19 = vpop.eup %740  ;;  %752 = vtanh.f32 %v293_v38 }
 0x13d   :  { %v743_v23 = vpop.eup %742  ;;  %754 = vtanh.f32 %v296_v42 }
 0x13e   :  { %v745_v27 = vpop.eup %744 }
 0x13f   :  { %v1151_v13 = vpop.f32.mrf.mxu1  ;;  %v747_v31 = vpop.eup %746 }
 0x140   :  { %v749_v35 = vpop.eup %748  ;;  %v410_v14 = vadd.f32 %v1168_v44, %v1151_v13 }
 0x141   :  { %v751_v39 = vpop.eup %750 }
 0x142   :  { %456 = vmatmul.f32.gmra.mxu3 %v737_v12  ;;  %v753_v45 = vpop.eup %752  ;;  %v308_v12 = vadd.f32 %v1022_v33, %v307_v9 }
 0x143   :  { %v755_v54 = vpop.eup %754 }
 0x147   :  { %v1154_v16 = vpop.f32.mrf.mxu1 }
 0x148   :  { %v413_v10 = vadd.f32 %v1168_v44, %v1154_v16  ;;  %v310_v16 = vpop.f32.mrf.mxu2 }
 0x14a   :  { %459 = vmatmul.f32.gmra.mxu3 %v739_v15 }
 0x14f   :  { %v1157_v20 = vpop.f32.mrf.mxu1 }
 0x150   :  { %v416_v5 = vadd.f32 %v1168_v44, %v1157_v20  ;;  %v311_v20 = vadd.f32 %v1022_v33, %v310_v16 }
 0x152   :  { %462 = vmatmul.f32.gmra.mxu3 %v741_v19 }
 0x157   :  { %v418_v24 = vpop.f32.mrf.mxu1 }
 0x158   :  { %v419_v1 = vadd.f32 %v1168_v44, %v418_v24  ;;  %v398_v24 = vadd.f32 %v1168_v44, %v1138_v56  ;;  %v389_v56 = vadd.f32 %v1168_v44, %v1129_v43 }
 0x15a   :  { %465 = vmatmul.f32.gmra.mxu3 %v743_v23  ;;  %v401_v23 = vadd.f32 %v1168_v44, %v1141_v61  ;;  %v392_v61 = vadd.f32 %v1168_v44, %v1132_v47 }
 0x15f   :  { %v421_v28 = vpop.f32.mrf.mxu1 }
 0x160   :  { %v422_v60 = vadd.f32 %v1168_v44, %v421_v28 }
 0x162   :  { %468 = vmatmul.f32.gmra.mxu3 %v745_v27 }
 0x167   :  { %v424_v32 = vpop.f32.mrf.mxu1 }
 0x168   :  { %v425_v57 = vadd.f32 %v1168_v44, %v424_v32 }
 0x16a   :  { %471 = vmatmul.f32.gmra.mxu3 %v747_v31 }
 0x16f   :  { %v427_v36 = vpop.f32.mrf.mxu1 }
 0x170   :  { %v428_v53 = vadd.f32 %v1168_v44, %v427_v36 }
 0x172   :  { %474 = vmatmul.f32.gmra.mxu3 %v749_v35 }
 0x177   :  { %v430_v40 = vpop.f32.mrf.mxu1 }
 0x178   :  { %v431_v49 = vadd.f32 %v1168_v44, %v430_v40 }
 0x17a   :  { %477 = vmatmul.f32.gmra.mxu3 %v751_v39 }
 0x17f   :  { %v433_v46 = vpop.f32.mrf.mxu1 }
 0x180   :  { %v434_v48 = vadd.f32 %v1168_v44, %v433_v46 }
 0x182   :  { %756 = vtanh.f32 %v434_v48  ;;  %480 = vmatmul.f32.gmra.mxu3 %v753_v45 }
 0x183   :  { %758 = vtanh.f32 %v431_v49 }
 0x184   :  { %760 = vtanh.f32 %v299_v52 }
 0x185   :  { %762 = vtanh.f32 %v428_v53 }
 0x186   :  { %764 = vtanh.f32 %v425_v57 }
 0x187   :  { %766 = vtanh.f32 %v302_v59  ;;  %v1203_v40 = vpop.f32.mrf.mxu1 }
 0x188   :  { %v757_v55 = vpop.eup %756  ;;  %768 = vtanh.f32 %v422_v60 }
 0x189   :  { %541 = vmatpush.xpose.msrb.mxu2 %v757_v55  ;;  %v759_v58 = vpop.eup %758  ;;  %770 = vtanh.f32 %v419_v1 }
 0x18a   :  { %483 = vmatmul.f32.gmra.mxu3 %v755_v54  ;;  %v761_v63 = vpop.eup %760  ;;  %772 = vtanh.f32 %v305_v4 }
 0x18b   :  { %v763_v0 = vpop.eup %762  ;;  %774 = vtanh.f32 %v416_v5 }
 0x18c   :  { %v765_v3 = vpop.eup %764  ;;  %776 = vtanh.f32 %v413_v10 }
 0x18d   :  { %542 = vmatpush.xpose.msrb.mxu2 %v759_v58  ;;  %v767_v6 = vpop.eup %766  ;;  %778 = vtanh.f32 %v308_v12 }
 0x18e   :  { %v769_v7 = vpop.eup %768  ;;  %780 = vtanh.f32 %v410_v14  ;;  %v540_v14 = vld [vmem:[%s1246_s5] sm:$0x1]  ;;  %s868_s5 = smov [#allocation2]  }
 0x18f   :  { %v771_v11 = vpop.eup %770  ;;  %782 = vtanh.f32 %v407_v18  ;;  %v439_v49 = vpop.f32.mrf.mxu1  ;;  %s621_s30 = sshll.u32 %s868_s5, 4  ;;  %s622_s30 = int_to_ptr.vmem [resolvable:$true] %s621_s30 }
 0x190   :  { %v773_v15 = vpop.eup %772  ;;  %784 = vtanh.f32 %v311_v20 }
 0x191   :  { %543 = vmatpush.xpose.msrb.mxu2 %v763_v0  ;;  %v775_v17 = vpop.eup %774  ;;  %786 = vtanh.f32 %v404_v21 }
 0x192   :  { %486 = vmatmul.f32.gmra.mxu3 %v761_v63  ;;  %v777_v19 = vpop.eup %776  ;;  %788 = vtanh.f32 %v401_v23 }
 0x193   :  { %v779_v13 = vpop.eup %778  ;;  %790 = vtanh.f32 %v398_v24 }
 0x194   :  { %v781_v22 = vpop.eup %780  ;;  %792 = vtanh.f32 %v395_v2  ;;  %v437_v2 = vadd.f32 %v1168_v44, %v1203_v40 }
 0x195   :  { %544 = vmatpush.xpose.msrb.mxu2 %v765_v3  ;;  %v783_v8 = vpop.eup %782  ;;  %794 = vtanh.f32 %v392_v61 }
 0x196   :  { %v785_v33 = vpop.eup %784  ;;  %796 = vtanh.f32 %v389_v56 }
 0x197   :  { %v787_v25 = vpop.eup %786  ;;  %v442_v58 = vpop.f32.mrf.mxu1 }
 0x198   :  { %v789_v26 = vpop.eup %788 }
 0x199   :  { %545 = vmatpush.xpose.msrb.mxu2 %v769_v7  ;;  %v791_v28 = vpop.eup %790 }
 0x19a   :  { %489 = vmatmul.f32.gmra.mxu3 %v767_v6  ;;  %v793_v29 = vpop.eup %792 }
 0x19b   :  { %v795_v51 = vpop.eup %794 }
 0x19c   :  { %v797_v31 = vpop.eup %796 }
 0x19d   :  { %546 = vmatpush.xpose.msrb.mxu2 %v771_v11 }
 0x19f   :  { %v445_v3 = vpop.f32.mrf.mxu1 }
 0x1a0   :  { %v446_v16 = vadd.f32 %v1168_v44, %v445_v3 }
 0x1a1   :  { %547 = vmatpush.xpose.msrb.mxu2 %v775_v17 }
 0x1a2   :  { %492 = vmatmul.f32.gmra.mxu3 %v773_v15 }
 0x1a5   :  { %548 = vmatpush.xpose.msrb.mxu2 %v777_v19 }
 0x1a7   :  { %v448_v11 = vpop.f32.mrf.mxu1 }
 0x1a8   :  { %v449_v17 = vadd.f32 %v1168_v44, %v448_v11 }
 0x1a9   :  { %549 = vmatpush.xpose.msrb.mxu2 %v781_v22 }
 0x1aa   :  { %495 = vmatmul.f32.gmra.mxu3 %v779_v13  ;;  %v443_v13 = vadd.f32 %v1168_v44, %v442_v58 }
 0x1ad   :  { %550 = vmatpush.xpose.msrb.mxu2 %v783_v8  ;;  %v440_v8 = vadd.f32 %v1168_v44, %v439_v49 }
 0x1b1   :  { %551 = vmatpush.xpose.msrb.mxu2 %v787_v25 }
 0x1b2   :  { %498 = vmatmul.f32.gmra.mxu3 %v785_v33 }
 0x1b5   :  { %v1197_v27 = vpop.f32.mrf.mxu3  ;;  %552 = vmatpush.xpose.msrb.mxu2 %v789_v26 }
 0x1b6   :  { %v452_v10 = vadd.f32 %v1168_v44, %v1197_v27 }
 0x1b9   :  { %553 = vmatpush.xpose.msrb.mxu2 %v791_v28 }
 0x1bd   :  { %v454_v30 = vpop.f32.mrf.mxu3  ;;  %554 = vmatpush.xpose.msrb.mxu2 %v793_v29 }
 0x1be   :  { %v455_v7 = vadd.f32 %v1168_v44, %v454_v30 }
 0x1c1   :  { %555 = vmatpush.xpose.msrb.mxu2 %v795_v51 }
 0x1c5   :  { %v457_v32 = vpop.f32.mrf.mxu3  ;;  %556 = vmatpush.xpose.msrb.mxu2 %v797_v31 }
 0x1c6   :  { %v458_v4 = vadd.f32 %v1168_v44, %v457_v32 }
 0x1c8   :  { %557 = vmatmul.f32.vlgmr.msrb.gmra.mxu2 %v540_v14 }
 0x1cd   :  { %v460_v34 = vpop.f32.mrf.mxu3 }
 0x1ce   :  { %v461_v0 = vadd.f32 %v1168_v44, %v460_v34 }
 0x1d5   :  { %v463_v35 = vpop.f32.mrf.mxu3 }
 0x1d6   :  { %v464_v60 = vadd.f32 %v1168_v44, %v463_v35 }
 0x1dd   :  { %v466_v36 = vpop.f32.mrf.mxu3 }
 0x1de   :  { %v467_v57 = vadd.f32 %v1168_v44, %v466_v36 }
 0x1e5   :  { %v469_v47 = vpop.f32.mrf.mxu3 }
 0x1e6   :  { %v470_v53 = vadd.f32 %v1168_v44, %v469_v47  ;;  %v611_v47 = vlaneseq }
 0x1e8   :  { %vm613_vm3 = vcmp.lt.s32.totalorder %v611_v47, 304 }
 0x1ed   :  { %v472_v37 = vpop.f32.mrf.mxu3 }
 0x1ee   :  { %v473_v50 = vadd.f32 %v1168_v44, %v472_v37 }
 0x1f5   :  { %v475_v38 = vpop.f32.mrf.mxu3 }
 0x1f6   :  { %v476_v45 = vadd.f32 %v1168_v44, %v475_v38 }
 0x1fd   :  { %v478_v39 = vpop.f32.mrf.mxu3 }
 0x1fe   :  { %v479_v42 = vadd.f32 %v1168_v44, %v478_v39 }
 0x205   :  { %v481_v43 = vpop.f32.mrf.mxu3 }
 0x206   :  { %v482_v41 = vadd.f32 %v1168_v44, %v481_v43 }
 0x208   :  { %798 = vtanh.f32 %v482_v41 }
 0x209   :  { %800 = vtanh.f32 %v479_v42 }
 0x20a   :  { %802 = vtanh.f32 %v476_v45 }
 0x20b   :  { %804 = vtanh.f32 %v473_v50 }
 0x20c   :  { %806 = vtanh.f32 %v470_v53 }
 0x20d   :  { %v1208_v46 = vpop.f32.mrf.mxu3  ;;  %808 = vtanh.f32 %v467_v57 }
 0x20e   :  { %v799_v48 = vpop.eup %798  ;;  %810 = vtanh.f32 %v464_v60  ;;  %v485_v30 = vadd.f32 %v1168_v44, %v1208_v46 }
 0x20f   :  { %561 = vmatpush.xpose.msrb.mxu3 %v799_v48  ;;  %v801_v52 = vpop.eup %800  ;;  %812 = vtanh.f32 %v461_v0 }
 0x210   :  { %v803_v55 = vpop.eup %802  ;;  %814 = vtanh.f32 %v458_v4 }
 0x211   :  { %v805_v59 = vpop.eup %804  ;;  %816 = vtanh.f32 %v455_v7 }
 0x212   :  { %v807_v63 = vpop.eup %806  ;;  %818 = vtanh.f32 %v452_v10 }
 0x213   :  { %562 = vmatpush.xpose.msrb.mxu3 %v801_v52  ;;  %v809_v1 = vpop.eup %808  ;;  %820 = vtanh.f32 %v449_v17 }
 0x214   :  { %v811_v6 = vpop.eup %810  ;;  %822 = vtanh.f32 %v446_v16 }
 0x215   :  { %v1212_v54 = vpop.f32.mrf.mxu3  ;;  %v813_v9 = vpop.eup %812 }
 0x216   :  { %v815_v15 = vpop.eup %814  ;;  %v488_v28 = vadd.f32 %v1168_v44, %v1212_v54 }
 0x217   :  { %563 = vmatpush.xpose.msrb.mxu3 %v803_v55  ;;  %v817_v18 = vpop.eup %816 }
 0x218   :  { %v819_v20 = vpop.eup %818 }
 0x219   :  { %v821_v23 = vpop.eup %820 }
 0x21a   :  { %v823_v33 = vpop.eup %822 }
 0x21b   :  { %564 = vmatpush.xpose.msrb.mxu3 %v805_v59 }
 0x21d   :  { %v490_v62 = vpop.f32.mrf.mxu3 }
 0x21e   :  { %v491_v26 = vadd.f32 %v1168_v44, %v490_v62 }
 0x21f   :  { %565 = vmatpush.xpose.msrb.mxu3 %v807_v63 }
 0x223   :  { %566 = vmatpush.xpose.msrb.mxu3 %v809_v1 }
 0x225   :  { %v493_v5 = vpop.f32.mrf.mxu3 }
 0x226   :  { %v494_v24 = vadd.f32 %v1168_v44, %v493_v5 }
 0x227   :  { %567 = vmatpush.xpose.msrb.mxu3 %v811_v6 }
 0x22b   :  { %568 = vmatpush.xpose.msrb.mxu3 %v813_v9 }
 0x22d   :  { %v496_v12 = vpop.f32.mrf.mxu3 }
 0x22e   :  { %v497_v22 = vadd.f32 %v1168_v44, %v496_v12 }
 0x22f   :  { %569 = vmatpush.xpose.msrb.mxu3 %v815_v15 }
 0x233   :  { %570 = vmatpush.xpose.msrb.mxu3 %v817_v18 }
 0x235   :  { %v499_v19 = vpop.f32.mrf.mxu3 }
 0x236   :  { %v500_v21 = vadd.f32 %v1168_v44, %v499_v19 }
 0x237   :  { %571 = vmatpush.xpose.msrb.mxu3 %v819_v20 }
 0x238   :  { %824 = vtanh.f32 %v500_v21 }
 0x239   :  { %826 = vtanh.f32 %v443_v13 }
 0x23a   :  { %828 = vtanh.f32 %v497_v22 }
 0x23b   :  { %572 = vmatpush.xpose.msrb.mxu3 %v821_v23  ;;  %830 = vtanh.f32 %v440_v8 }
 0x23c   :  { %832 = vtanh.f32 %v494_v24 }
 0x23d   :  { %834 = vtanh.f32 %v437_v2 }
 0x23e   :  { %v825_v25 = vpop.eup %824  ;;  %836 = vtanh.f32 %v491_v26 }
 0x23f   :  { %573 = vmatpush.xpose.msrb.mxu3 %v823_v33  ;;  %591 = vmatpush.xpose.msra.mxu2 %v825_v25  ;;  %v827_v27 = vpop.eup %826  ;;  %838 = vtanh.f32 %v488_v28 }
 0x240   :  { %v829_v61 = vpop.eup %828  ;;  %840 = vtanh.f32 %v485_v30 }
 0x241   :  { %v831_v56 = vpop.eup %830 }
 0x242   :  { %v833_v29 = vpop.eup %832 }
 0x243   :  { %574 = vmatpush.xpose.msrb.mxu3 %v827_v27  ;;  %592 = vmatpush.xpose.msra.mxu2 %v829_v61  ;;  %v835_v51 = vpop.eup %834 }
 0x244   :  { %v837_v31 = vpop.eup %836 }
 0x245   :  { %v839_v32 = vpop.eup %838 }
 0x246   :  { %v841_v34 = vpop.eup %840 }
 0x247   :  { %575 = vmatpush.xpose.msrb.mxu3 %v831_v56  ;;  %593 = vmatpush.xpose.msra.mxu2 %v833_v29 }
 0x24b   :  { %576 = vmatpush.xpose.msrb.mxu3 %v835_v51  ;;  %594 = vmatpush.xpose.msra.mxu2 %v837_v31  ;;  %v558_v35 = vpop.f32.mrf.mxu2 }
 0x24e   :  { %577 = vmatmul.f32.vlgmr.msrb.gmra.mxu3 %v540_v14 }
 0x24f   :  { %595 = vmatpush.xpose.msra.mxu2 %v839_v32 }
 0x253   :  { %596 = vmatpush.xpose.msra.mxu2 %v841_v34 }
 0x256   :  { %597 = vmatmul.f32.vlgmr.msra.gmra.mxu2 %v540_v14 }
 0x2d1   :  { %v578_v36 = vpop.f32.mrf.mxu3 }
 0x2d2   :  { %v604_v37 = vrot.slane %v578_v36, 7 }
 0x2d4   :  { %v607_v39 = vsel %vm606_vm1, %v558_v35, %v604_v37 }
 0x2d9   :  { %v598_v44 = vpop.f32.mrf.mxu2 }
 0x2da   :  { %v605_v38 = vrot.slane %v598_v44, 6 }
 0x2dc   :  { %v609_v40 = vsel %vm608_vm2, %v607_v39, %v605_v38 }
 0x2dd   :  { %615 = vst.msk [vmem:[#allocation2] sm:$0x7] %vm613_vm3, %v609_v40 }
 0x2de   :  { %626 = dma.vmem_to_hbm [thread:$0]  %s622_s30, 48, %s624_s9, [#allocation3]  }
 0x2df   :  { %866 = dma.done.wait [#allocation3], 48  }
 0x2e0   :  { %867 = vsyncadd [#allocation3], 4294967248 }
 0x2e1   :  { %631 = vsyncpa [#allocation3], 1 }

</bundles_post_ra>
